<compile_context>
chip_gen: v7x
topology: tpu7x:2x2x1
jax: 0.10.0
libtpu: 0.0.40
codegen_flags: <defaults>
</compile_context>

<pallas_src>
import functools
import math

import jax
import jax.numpy as jnp
from jax.experimental import pallas as pl
from jax.experimental.pallas import tpu as pltpu

_LN_EPS = 1e-5            # torch.nn.LayerNorm default
_INV_SQRT2 = 0.7071067811865476


def _erf(x):
    # erf via Abramowitz & Stegun 7.1.26 (|abs err| <= 1.5e-7): only exp /
    # mul / add / div, all of which lower cleanly in Mosaic.
    p = 0.3275911
    a1, a2, a3, a4, a5 = (0.254829592, -0.284496736, 1.421413741,
                          -1.453152027, 1.061405429)
    s = jnp.where(x >= 0.0, 1.0, -1.0)
    ax = jnp.abs(x)
    t = 1.0 / (1.0 + p * ax)
    poly = ((((a5 * t + a4) * t + a3) * t + a2) * t + a1) * t
    return s * (1.0 - poly * jnp.exp(-ax * ax))


def _gelu(x):
    # x * 0.5 * (1 + erf(x / sqrt(2)))  — exact-erf gelu as in the torch module.
    return x * 0.5 * (1.0 + _erf(x * _INV_SQRT2))


def _ffn_kernel(x_ref, w1_ref, b1_ref, g_ref, beta_ref, w2_ref, b2_ref, o_ref,
                *, layer_norm: bool):
    x = x_ref[...].astype(jnp.float32)                                   # (TM, D_in)
    h = jnp.dot(x, w1_ref[...], preferred_element_type=jnp.float32)      # (TM, H)
    h = h + b1_ref[...]                                                  # row-broadcast bias
    h = _gelu(h)
    if layer_norm:
        mean = jnp.mean(h, axis=-1, keepdims=True)
        c = h - mean
        var = jnp.mean(c * c, axis=-1, keepdims=True)
        h = c * jax.lax.rsqrt(var + _LN_EPS)
        h = h * g_ref[...] + beta_ref[...]
    out = jnp.dot(h, w2_ref[...], preferred_element_type=jnp.float32) + b2_ref[...]
    o_ref[...] = out.astype(o_ref.dtype)                                 # (TM, D_out), lane-dense


def _round_up(x, m):
    return (x + m - 1) // m * m


def _pick_block_rows(m, d_in, h_dim, d_out,
                     max_rows=1024, budget_bytes=12 * 1024 * 1024):
    """Largest row tile (multiple of 8) whose working set fits a VMEM budget."""
    # Weights + small params are resident (constant block index => fetched once).
    weight_bytes = 4 * (d_in * h_dim + h_dim * d_out + 3 * h_dim + d_out)
    # Per-row bytes: double-buffered x / out tiles + f32 intermediates.
    per_row = 4 * (2 * d_in + 2 * d_out + h_dim + d_in + d_out)
    avail = max(budget_bytes - weight_bytes, per_row * 8)
    tm = max(8, min(max_rows, avail // per_row))
    tm = min(tm, _round_up(m, 8))
    return _round_up(tm, 8)


@functools.partial(jax.jit, static_argnames=("layer_norm",))
def ffn_layer(x, params, *, layer_norm=True):
    """FFNLayer forward: fc2(LN(gelu(fc1(dropout(x))))), dropout = identity (eval)."""
    orig_lead = x.shape[:-1]
    d_in = x.shape[-1]
    h_dim = params["w1"].shape[1]
    d_out = params["w2"].shape[1]

    m = int(math.prod(orig_lead)) if orig_lead else 1
    x2 = x.reshape(m, d_in)

    tm = _pick_block_rows(m, d_in, h_dim, d_out)
    m_pad = _round_up(m, tm)
    if m_pad != m:
        x2 = jnp.pad(x2, ((0, m_pad - m), (0, 0)))

    grid = (m_pad // tm,)

    flops = 2.0 * m_pad * (d_in * h_dim + h_dim * d_out)
    bytes_accessed = 4 * (m_pad * (d_in + d_out)
                          + d_in * h_dim + h_dim * d_out + 3 * h_dim + d_out)
    cost = pl.CostEstimate(flops=int(flops),
                           transcendentals=int(m_pad * h_dim),
                           bytes_accessed=int(bytes_accessed))

    kernel = functools.partial(_ffn_kernel, layer_norm=layer_norm)
    out = pl.pallas_call(
        kernel,
        grid=grid,
        in_specs=[
            pl.BlockSpec((tm, d_in), lambda i: (i, 0)),      # x tile (rows on sublanes)
            pl.BlockSpec((d_in, h_dim), lambda i: (0, 0)),   # w1 (resident)
            pl.BlockSpec((1, h_dim), lambda i: (0, 0)),      # b1
            pl.BlockSpec((1, h_dim), lambda i: (0, 0)),      # ln gamma
            pl.BlockSpec((1, h_dim), lambda i: (0, 0)),      # ln beta
            pl.BlockSpec((h_dim, d_out), lambda i: (0, 0)),  # w2 (resident)
            pl.BlockSpec((1, d_out), lambda i: (0, 0)),      # b2
        ],
        out_specs=pl.BlockSpec((tm, d_out), lambda i: (i, 0)),
        out_shape=jax.ShapeDtypeStruct((m_pad, d_out), x.dtype),
        compiler_params=pltpu.CompilerParams(dimension_semantics=("parallel",)),
        cost_estimate=cost,
    )(x2, params["w1"], params["b1"], params["gamma"], params["beta"],
      params["w2"], params["b2"])

    return out[:m].reshape(*orig_lead, d_out)


def init_params(key, d_in, d_hidden, d_out):
    """Deterministic init mirroring torch nn.Linear defaults (uniform +-1/sqrt(fan_in))."""
    ks = jax.random.split(key, 4)

    def unif(k, shape, fan_in):
        b = 1.0 / math.sqrt(float(fan_in))
        return jax.random.uniform(k, shape, jnp.float32, -b, b)

    return dict(
        w1=unif(ks[0], (d_in, d_hidden), d_in),
        b1=unif(ks[1], (1, d_hidden), d_in),
        gamma=jnp.ones((1, d_hidden), jnp.float32),   # LayerNorm weight
        beta=jnp.zeros((1, d_hidden), jnp.float32),   # LayerNorm bias
        w2=unif(ks[2], (d_hidden, d_out), d_hidden),
        b2=unif(ks[3], (1, d_out), d_hidden),
    )


def _reference(x, params, layer_norm=True):
    """Pure-JAX reference replicating the torch module (eval mode)."""
    h = x @ params["w1"] + params["b1"][0]
    h = h * 0.5 * (1.0 + jax.scipy.special.erf(h / jnp.sqrt(2.0)))
    if layer_norm:
        mean = jnp.mean(h, axis=-1, keepdims=True)
        var = jnp.mean((h - mean) ** 2, axis=-1, keepdims=True)
        h = (h - mean) / jnp.sqrt(var + _LN_EPS)
        h = h * params["gamma"][0] + params["beta"][0]
    return h @ params["w2"] + params["b2"][0]


if __name__ == "__main__":
    B, S, D_IN, D_HID, D_OUT = 2, 8, 32, 64, 32
    key = jax.random.PRNGKey(0)
    kx, kp = jax.random.split(key)

    x = jax.random.normal(kx, (B, S, D_IN), jnp.float32)
    params = init_params(kp, D_IN, D_HID, D_OUT)

    out = ffn_layer(x, params, layer_norm=True)
    out = jax.block_until_ready(out)
    assert out.shape == (B, S, D_OUT), out.shape

    ref = _reference(x, params, layer_norm=True)
    max_err = float(jnp.max(jnp.abs(out - ref)))
    assert jnp.allclose(out, ref, rtol=2e-4, atol=2e-4), max_err

    # Also exercise the layer_norm=False path (ln=None in the torch module).
    out_nl = jax.block_until_ready(ffn_layer(x, params, layer_norm=False))
    ref_nl = _reference(x, params, layer_norm=False)
    assert jnp.allclose(out_nl, ref_nl, rtol=2e-4, atol=2e-4)

    print("KERNEL_OK")
</pallas_src>

<mosaic_0001>
module attributes {stable_mosaic.version = 11 : i64} {
  func.func @_ffn_kernel(%arg0: i32, %arg1: memref<16x32xf32, #tpu.memory_space<vmem>>, %arg2: memref<32x64xf32, #tpu.memory_space<vmem>>, %arg3: memref<1x64xf32, #tpu.memory_space<vmem>>, %arg4: memref<1x64xf32, #tpu.memory_space<vmem>>, %arg5: memref<1x64xf32, #tpu.memory_space<vmem>>, %arg6: memref<64x32xf32, #tpu.memory_space<vmem>>, %arg7: memref<1x32xf32, #tpu.memory_space<vmem>>, %arg8: memref<16x32xf32, #tpu.memory_space<vmem>>) attributes {dimension_semantics = [#tpu.dimension_semantics<parallel>], iteration_bounds = array<i64: 1>, scalar_prefetch = 0 : i64, scratch_operands = 0 : i64, tpu.core_type = #tpu.core_type<tc>, window_params = [{transform_indices = @transform_0, window_bounds = array<i64: 16, 32>}, {pipeline_mode = #tpu.pipeline_mode<synchronous>, transform_indices = @transform_1, window_bounds = array<i64: 32, 64>}, {pipeline_mode = #tpu.pipeline_mode<synchronous>, transform_indices = @transform_2, window_bounds = array<i64: 1, 64>}, {pipeline_mode = #tpu.pipeline_mode<synchronous>, transform_indices = @transform_3, window_bounds = array<i64: 1, 64>}, {pipeline_mode = #tpu.pipeline_mode<synchronous>, transform_indices = @transform_4, window_bounds = array<i64: 1, 64>}, {pipeline_mode = #tpu.pipeline_mode<synchronous>, transform_indices = @transform_5, window_bounds = array<i64: 64, 32>}, {pipeline_mode = #tpu.pipeline_mode<synchronous>, transform_indices = @transform_6, window_bounds = array<i64: 1, 32>}, {transform_indices = @transform_7, window_bounds = array<i64: 16, 32>}]} {
    %c0 = arith.constant 0 : index
    %c0_0 = arith.constant 0 : index
    %0 = vector.load %arg1[%c0, %c0_0] : memref<16x32xf32, #tpu.memory_space<vmem>>, vector<16x32xf32>
    %c0_1 = arith.constant 0 : index
    %c0_2 = arith.constant 0 : index
    %1 = vector.load %arg2[%c0_1, %c0_2] : memref<32x64xf32, #tpu.memory_space<vmem>>, vector<32x64xf32>
    %cst = arith.constant dense<0.000000e+00> : vector<16x64xf32>
    %2 = tpu.matmul %0, %1, %cst {dimension_numbers = #tpu.dot_dimension_numbers<[1], [0], [0], [1], [0, 0, 1, 1], [], []>} : vector<16x32xf32>, vector<32x64xf32>, vector<16x64xf32> -> vector<16x64xf32>
    %c0_3 = arith.constant 0 : index
    %c0_4 = arith.constant 0 : index
    %3 = vector.load %arg3[%c0_3, %c0_4] : memref<1x64xf32, #tpu.memory_space<vmem>>, vector<1x64xf32>
    %4 = vector.broadcast %3 : vector<1x64xf32> to vector<16x64xf32>
    %5 = arith.addf %2, %4 : vector<16x64xf32>
    %cst_5 = arith.constant 5.000000e-01 : f32
    %6 = vector.broadcast %cst_5 : f32 to vector<16x64xf32>
    %7 = arith.mulf %5, %6 : vector<16x64xf32>
    %cst_6 = arith.constant 0.707106769 : f32
    %8 = vector.broadcast %cst_6 : f32 to vector<16x64xf32>
    %9 = arith.mulf %5, %8 : vector<16x64xf32>
    %cst_7 = arith.constant 0.000000e+00 : f32
    %10 = vector.broadcast %cst_7 : f32 to vector<16x64xf32>
    %11 = arith.cmpf oge, %9, %10 : vector<16x64xf32>
    %cst_8 = arith.constant 1.000000e+00 : f32
    %cst_9 = arith.constant -1.000000e+00 : f32
    %12 = vector.broadcast %cst_8 : f32 to vector<16x64xf32>
    %13 = vector.broadcast %cst_9 : f32 to vector<16x64xf32>
    %14 = arith.select %11, %12, %13 : vector<16x64xi1>, vector<16x64xf32>
    %15 = math.absf %9 : vector<16x64xf32>
    %cst_10 = arith.constant 0.327591091 : f32
    %16 = vector.broadcast %cst_10 : f32 to vector<16x64xf32>
    %17 = arith.mulf %16, %15 : vector<16x64xf32>
    %cst_11 = arith.constant 1.000000e+00 : f32
    %18 = vector.broadcast %cst_11 : f32 to vector<16x64xf32>
    %19 = arith.addf %18, %17 : vector<16x64xf32>
    %cst_12 = arith.constant 1.000000e+00 : f32
    %20 = vector.broadcast %cst_12 : f32 to vector<16x64xf32>
    %21 = arith.divf %20, %19 : vector<16x64xf32>
    %cst_13 = arith.constant 1.06140542 : f32
    %22 = vector.broadcast %cst_13 : f32 to vector<16x64xf32>
    %23 = arith.mulf %22, %21 : vector<16x64xf32>
    %cst_14 = arith.constant -1.45315206 : f32
    %24 = vector.broadcast %cst_14 : f32 to vector<16x64xf32>
    %25 = arith.addf %23, %24 : vector<16x64xf32>
    %26 = arith.mulf %25, %21 : vector<16x64xf32>
    %cst_15 = arith.constant 1.42141378 : f32
    %27 = vector.broadcast %cst_15 : f32 to vector<16x64xf32>
    %28 = arith.addf %26, %27 : vector<16x64xf32>
    %29 = arith.mulf %28, %21 : vector<16x64xf32>
    %cst_16 = arith.constant -0.284496725 : f32
    %30 = vector.broadcast %cst_16 : f32 to vector<16x64xf32>
    %31 = arith.addf %29, %30 : vector<16x64xf32>
    %32 = arith.mulf %31, %21 : vector<16x64xf32>
    %cst_17 = arith.constant 0.254829586 : f32
    %33 = vector.broadcast %cst_17 : f32 to vector<16x64xf32>
    %34 = arith.addf %32, %33 : vector<16x64xf32>
    %35 = arith.mulf %34, %21 : vector<16x64xf32>
    %cst_18 = arith.constant 0.000000e+00 : f32
    %36 = vector.broadcast %cst_18 : f32 to vector<16x64xf32>
    %37 = arith.subf %36, %15 : vector<16x64xf32>
    %38 = arith.mulf %37, %15 : vector<16x64xf32>
    %39 = math.exp %38 : vector<16x64xf32>
    %40 = arith.mulf %35, %39 : vector<16x64xf32>
    %cst_19 = arith.constant 1.000000e+00 : f32
    %41 = vector.broadcast %cst_19 : f32 to vector<16x64xf32>
    %42 = arith.subf %41, %40 : vector<16x64xf32>
    %43 = arith.mulf %14, %42 : vector<16x64xf32>
    %cst_20 = arith.constant 1.000000e+00 : f32
    %44 = vector.broadcast %cst_20 : f32 to vector<16x64xf32>
    %45 = arith.addf %44, %43 : vector<16x64xf32>
    %46 = arith.mulf %7, %45 : vector<16x64xf32>
    %cst_21 = arith.constant dense<0.000000e+00> : vector<16xf32>
    %47 = vector.multi_reduction <add>, %46, %cst_21 [1] : vector<16x64xf32> to vector<16xf32>
    %48 = vector.shape_cast %47 : vector<16xf32> to vector<16x1xf32>
    %cst_22 = arith.constant 6.400000e+01 : f32
    %49 = vector.broadcast %cst_22 : f32 to vector<16x1xf32>
    %50 = arith.divf %48, %49 : vector<16x1xf32>
    %51 = vector.broadcast %50 : vector<16x1xf32> to vector<16x64xf32>
    %52 = arith.subf %46, %51 : vector<16x64xf32>
    %53 = arith.mulf %52, %52 : vector<16x64xf32>
    %cst_23 = arith.constant dense<0.000000e+00> : vector<16xf32>
    %54 = vector.multi_reduction <add>, %53, %cst_23 [1] : vector<16x64xf32> to vector<16xf32>
    %55 = vector.shape_cast %54 : vector<16xf32> to vector<16x1xf32>
    %cst_24 = arith.constant 6.400000e+01 : f32
    %56 = vector.broadcast %cst_24 : f32 to vector<16x1xf32>
    %57 = arith.divf %55, %56 : vector<16x1xf32>
    %cst_25 = arith.constant 9.99999974E-6 : f32
    %58 = vector.broadcast %cst_25 : f32 to vector<16x1xf32>
    %59 = arith.addf %57, %58 : vector<16x1xf32>
    %60 = math.rsqrt %59 : vector<16x1xf32>
    %61 = vector.broadcast %60 : vector<16x1xf32> to vector<16x64xf32>
    %62 = arith.mulf %52, %61 : vector<16x64xf32>
    %c0_26 = arith.constant 0 : index
    %c0_27 = arith.constant 0 : index
    %63 = vector.load %arg4[%c0_26, %c0_27] : memref<1x64xf32, #tpu.memory_space<vmem>>, vector<1x64xf32>
    %64 = vector.broadcast %63 : vector<1x64xf32> to vector<16x64xf32>
    %65 = arith.mulf %62, %64 : vector<16x64xf32>
    %c0_28 = arith.constant 0 : index
    %c0_29 = arith.constant 0 : index
    %66 = vector.load %arg5[%c0_28, %c0_29] : memref<1x64xf32, #tpu.memory_space<vmem>>, vector<1x64xf32>
    %67 = vector.broadcast %66 : vector<1x64xf32> to vector<16x64xf32>
    %68 = arith.addf %65, %67 : vector<16x64xf32>
    %c0_30 = arith.constant 0 : index
    %c0_31 = arith.constant 0 : index
    %69 = vector.load %arg6[%c0_30, %c0_31] : memref<64x32xf32, #tpu.memory_space<vmem>>, vector<64x32xf32>
    %cst_32 = arith.constant dense<0.000000e+00> : vector<16x32xf32>
    %70 = tpu.matmul %68, %69, %cst_32 {dimension_numbers = #tpu.dot_dimension_numbers<[1], [0], [0], [1], [0, 0, 1, 1], [], []>} : vector<16x64xf32>, vector<64x32xf32>, vector<16x32xf32> -> vector<16x32xf32>
    %c0_33 = arith.constant 0 : index
    %c0_34 = arith.constant 0 : index
    %71 = vector.load %arg7[%c0_33, %c0_34] : memref<1x32xf32, #tpu.memory_space<vmem>>, vector<1x32xf32>
    %72 = vector.broadcast %71 : vector<1x32xf32> to vector<16x32xf32>
    %73 = arith.addf %70, %72 : vector<16x32xf32>
    %c0_35 = arith.constant 0 : index
    %c0_36 = arith.constant 0 : index
    %74 = vector.load %arg8[%c0_35, %c0_36] : memref<16x32xf32, #tpu.memory_space<vmem>>, vector<16x32xf32>
    tpu.vector_store %arg8[%c0_35, %c0_36], %73 {strides = array<i32>} : memref<16x32xf32, #tpu.memory_space<vmem>>, vector<16x32xf32>,
    return
  }
  func.func @transform_0(%arg0: i32) -> (i32, i32) {
    %c0_i32 = arith.constant 0 : i32
    %c0_i32_0 = arith.constant 0 : i32
    return %arg0, %c0_i32 : i32, i32
  }
  func.func @transform_1(%arg0: i32) -> (i32, i32) {
    %c0_i32 = arith.constant 0 : i32
    %c0_i32_0 = arith.constant 0 : i32
    %c0_i32_1 = arith.constant 0 : i32
    return %c0_i32, %c0_i32_0 : i32, i32
  }
  func.func @transform_2(%arg0: i32) -> (i32, i32) {
    %c0_i32 = arith.constant 0 : i32
    %c0_i32_0 = arith.constant 0 : i32
    %c0_i32_1 = arith.constant 0 : i32
    return %c0_i32, %c0_i32_0 : i32, i32
  }
  func.func @transform_3(%arg0: i32) -> (i32, i32) {
    %c0_i32 = arith.constant 0 : i32
    %c0_i32_0 = arith.constant 0 : i32
    %c0_i32_1 = arith.constant 0 : i32
    return %c0_i32, %c0_i32_0 : i32, i32
  }
  func.func @transform_4(%arg0: i32) -> (i32, i32) {
    %c0_i32 = arith.constant 0 : i32
    %c0_i32_0 = arith.constant 0 : i32
    %c0_i32_1 = arith.constant 0 : i32
    return %c0_i32, %c0_i32_0 : i32, i32
  }
  func.func @transform_5(%arg0: i32) -> (i32, i32) {
    %c0_i32 = arith.constant 0 : i32
    %c0_i32_0 = arith.constant 0 : i32
    %c0_i32_1 = arith.constant 0 : i32
    return %c0_i32, %c0_i32_0 : i32, i32
  }
  func.func @transform_6(%arg0: i32) -> (i32, i32) {
    %c0_i32 = arith.constant 0 : i32
    %c0_i32_0 = arith.constant 0 : i32
    %c0_i32_1 = arith.constant 0 : i32
    return %c0_i32, %c0_i32_0 : i32, i32
  }
  func.func @transform_7(%arg0: i32) -> (i32, i32) {
    %c0_i32 = arith.constant 0 : i32
    %c0_i32_0 = arith.constant 0 : i32
    return %arg0, %c0_i32 : i32, i32
  }
}

</mosaic_0001>

<bundles_post_ra>
// kernel: ffn_layer.1
= control target key start
LH: loop header
LB: loop body
LE: loop exit
PB: predicated region body
PF: predicated region fallthrough
CT: control target
= control target key end

     0   :  { %vm40_vm0 = vcmask 261120   ;;  %s574_s0 = inlined_call_operand.vmem [shape: f32[16,32], index: 0, kind: input, shape index: {}]   ;;  %s575_s1 = inlined_call_operand.vmem [shape: f32[32,64], index: 1, kind: input, shape index: {}]   ;;  %s576_s2 = inlined_call_operand.vmem [shape: f32[1,64], index: 2, kind: input, shape index: {}]   ;;  %s577_s3 = inlined_call_operand.vmem [shape: f32[1,64], index: 3, kind: input, shape index: {}]   ;;  %s578_s4 = inlined_call_operand.vmem [shape: f32[1,64], index: 4, kind: input, shape index: {}]   ;;  %s579_s5 = inlined_call_operand.vmem [shape: f32[64,32], index: 5, kind: input, shape index: {}]   ;;  %s580_s6 = inlined_call_operand.vmem [shape: f32[1,32], index: 6, kind: input, shape index: {}]   ;;  %s581_s7 = inlined_call_operand.hbm [shape: f32[16,32], index: 7, kind: output, shape index: {}]  }
   0x1   :  { %v29_v0 = vld [vmem:[%s575_s1] sm:$0xff]  ;;  %v30_v1 = vld [vmem:[%s575_s1 + $0x8] sm:$0xff]  ;;  %v31_v2 = vld [vmem:[%s575_s1 + $0x10] sm:$0xff] }
   0x2   :  { %v390_v3 = vpack.c.bf16 %v30_v1, %v29_v0  ;;  %v32_v4 = vld [vmem:[%s575_s1 + $0x18] sm:$0xff]  ;;  %v27_v5 = vld [vmem:[%s574_s0] sm:$0xff] }
   0x3   :  { %v394_v6 = vpack.c.bf16 %v32_v4, %v31_v2  ;;  %368 = vmatprep.mubr.msk.f32.mxu0 %vm40_vm0, %v27_v5 }
   0x4   :  { %12 = vsyncpa [#allocation3], 0  ;;  %391 = vmatprep.subr.bf16.mxu0 %v390_v3  ;;  %v28_v7 = vld [vmem:[%s574_s0 + $0x8] sm:$0xff]  ;;  %v336_v8 = vld [vmem:[%s576_s2] ss:$0 sm:$0xff]  ;;  %v454_v52 = vmov -1.0  }
   0x5   :  { %393 = vmatpush3.bf16.msra.mxu0 %v390_v3  ;;  %vm176_vm3 = vcmask 523264  }
   0x6   :  { %395 = vmatprep.subr.bf16.mxu0 %v394_v6 }
   0x9   :  { %397 = vmatpush3.bf16.msra.mxu0 %v394_v6 }
   0xc   :  { %369 = vmatmul.mubr.msk.f32.vlgmr.msra.gmra.mrb[0].mxu0 %vm40_vm0, %v28_v7 }
  0xdf   :  { %v370_v9 = vpop.f32.mrb[0].mxu0 }
  0xe0   :  { %v119_v10 = vadd.f32 %v370_v9, %v336_v8  ;;  %v113_v11 = vpop.f32.mrb[1].mxu0 }
  0xe1   :  { %v114_v12 = vadd.f32 %v336_v8, %v113_v11 }
  0xe2   :  { %v125_v13 = vmul.f32 0.70710677, %v119_v10  ;;  %v123_v61 = vmul.f32 0.5, %v119_v10 }
  0xe3   :  { %v124_v14 = vmul.f32 0.70710677, %v114_v12  ;;  %v122_v58 = vmul.f32 0.5, %v114_v12  ;;  %v222_v12 = vld [vmem:[%s579_s5] sm:$0xff] }
  0xe4   :  { %v131_v15 = vand.u32 2147483647, %v125_v13  ;;  %vm127_vm1 = vcmp.ge.f32.partialorder %v125_v13, 0.0  ;;  %v223_v13 = vld [vmem:[%s579_s5 + $0x8] sm:$0xff] }
  0xe5   :  { %v130_v16 = vand.u32 2147483647, %v124_v14  ;;  %vm126_vm2 = vcmp.ge.f32.partialorder %v124_v14, 0.0  ;;  %v129_v53 = vsel %vm127_vm1, 1.0, %v454_v52  ;;  %v398_v14 = vpack.c.bf16 %v223_v13, %v222_v12 }
  0xe6   :  { %v133_v17 = vmul.f32 0.3275911, %v131_v15  ;;  %v159_v21 = vsub.f32 0.0, %v131_v15  ;;  %v128_v55 = vsel %vm126_vm2, 1.0, %v454_v52 }
  0xe7   :  { %v132_v18 = vmul.f32 0.3275911, %v130_v16  ;;  %v158_v22 = vsub.f32 0.0, %v130_v16  ;;  %399 = vmatprep.subr.bf16.mxu1 %v398_v14 }
  0xe8   :  { %v135_v19 = vadd.f32 1.0, %v133_v17  ;;  %v161_v24 = vmul.f32 %v159_v21, %v131_v15  ;;  %v224_v15 = vld [vmem:[%s579_s5 + $0x10] sm:$0xff]  ;;  %v226_v17 = vld [vmem:[%s579_s5 + $0x20] sm:$0xff]  ;;  %401 = vmatpush3.bf16.msra.mxu1 %v398_v14 }
  0xe9   :  { %v134_v20 = vadd.f32 1.0, %v132_v18  ;;  %v160_v26 = vmul.f32 %v158_v22, %v130_v16  ;;  %v225_v16 = vld [vmem:[%s579_s5 + $0x18] sm:$0xff]  ;;  %v228_v21 = vld [vmem:[%s579_s5 + $0x30] sm:$0xff] }
  0xea   :  { %418 = vrcp.f32 %v135_v19  ;;  %v164_v30 = vmul.f32 1.442695, %v161_v24  ;;  %v402_v18 = vpack.c.bf16 %v225_v16, %v224_v15  ;;  %v227_v19 = vld [vmem:[%s579_s5 + $0x28] sm:$0xff]  ;;  %v229_v22 = vld [vmem:[%s579_s5 + $0x38] sm:$0xff] }
  0xeb   :  { %420 = vrcp.f32 %v134_v20  ;;  %v162_v32 = vmul.f32 1.442695, %v160_v26  ;;  %v406_v20 = vpack.c.bf16 %v227_v19, %v226_v17 }
  0xec   :  { %422 = vpow2.f32 %v164_v30  ;;  %403 = vmatprep.subr.bf16.mxu1 %v402_v18 }
  0xed   :  { %424 = vpow2.f32 %v162_v32  ;;  %405 = vmatpush3.bf16.msra.mxu1 %v402_v18 }
  0xee   :  { %407 = vmatprep.subr.bf16.mxu1 %v406_v20 }
  0xf1   :  { %409 = vmatpush3.bf16.msra.mxu1 %v406_v20 }
  0xf4   :  { %v419_v23 = vpop.eup %418 }
  0xf5   :  { %v421_v25 = vpop.eup %420  ;;  %v141_v27 = vmul.f32 1.0614054, %v419_v23 }
  0xf6   :  { %v140_v28 = vmul.f32 1.0614054, %v421_v25  ;;  %v423_v46 = vpop.eup %422 }
  0xf7   :  { %v143_v29 = vadd.f32 -1.4531521, %v141_v27  ;;  %v425_v48 = vpop.eup %424 }
  0xf8   :  { %v142_v31 = vadd.f32 -1.4531521, %v140_v28 }
  0xf9   :  { %v145_v33 = vmul.f32 %v419_v23, %v143_v29 }
  0xfa   :  { %v144_v34 = vmul.f32 %v421_v25, %v142_v31  ;;  %v339_v31 = vld [vmem:[%s577_s3] ss:$0 sm:$0xff]  ;;  %s455_s3 = smov [#allocation2]  }
  0xfb   :  { %v147_v35 = vadd.f32 1.4214138, %v145_v33  ;;  %v340_v33 = vld [vmem:[%s578_s4] ss:$0 sm:$0xff]  ;;  %s325_s10 = sshll.u32 %s455_s3, 4  ;;  %s326_s10 = int_to_ptr.vmem [resolvable:$true] %s325_s10 }
  0xfc   :  { %v146_v36 = vadd.f32 1.4214138, %v144_v34  ;;  %s430_s4 = scalar_lea.vmem %s326_s10, 256  ;;  %p435_p1 = scmp.lt.s32.totalorder %s326_s10, %s326_s10 }
  0xfd   :  { %v149_v37 = vmul.f32 %v419_v23, %v147_v35  ;;  %p431_p0 = scmp.ne.s32.totalorder %s326_s10, %s430_s4  ;;  %p436_p2 = scmp.lt.s32.totalorder %s430_s4, %s430_s4 }
  0xfe   :  { %v148_v38 = vmul.f32 %v421_v25, %v146_v36 }
  0xff   :  { %v151_v39 = vadd.f32 -0.28449672, %v149_v37  ;;  %p437_p3 = por %p436_p2, %p435_p1 }
 0x100   :  { %v150_v40 = vadd.f32 -0.28449672, %v148_v38 }
 0x101   :  { %v153_v41 = vmul.f32 %v419_v23, %v151_v39  ;;  %p438_p4 = pnand %p437_p3, %p431_p0 }
 0x102   :  { %v152_v42 = vmul.f32 %v421_v25, %v150_v40  ;;  %v341_v40 = vld [vmem:[%s580_s6] ss:$0 sm:$0xff] }
 0x103   :  { %v155_v43 = vadd.f32 0.2548296, %v153_v41 }
 0x104   :  { %v154_v44 = vadd.f32 0.2548296, %v152_v42 }
 0x105   :  { %v157_v45 = vmul.f32 %v419_v23, %v155_v43  ;;  %v410_v23 = vpack.c.bf16 %v229_v22, %v228_v21 }
 0x106   :  { %v156_v47 = vmul.f32 %v421_v25, %v154_v44 }
 0x107   :  { %v167_v49 = vmul.f32 %v423_v46, %v157_v45  ;;  %411 = vmatprep.subr.bf16.mxu1 %v410_v23 }
 0x108   :  { %v166_v50 = vmul.f32 %v425_v48, %v156_v47  ;;  %413 = vmatpush3.bf16.msra.mxu1 %v410_v23 }
 0x109   :  { %v169_v51 = vsub.f32 1.0, %v167_v49 }
 0x10a   :  { %v168_v54 = vsub.f32 1.0, %v166_v50 }
 0x10b   :  { %v171_v56 = vmul.f32 %v169_v51, %v129_v53 }
 0x10c   :  { %v170_v57 = vmul.f32 %v168_v54, %v128_v55 }
 0x10d   :  { %v173_v60 = vadd.f32 1.0, %v171_v56 }
 0x10e   :  { %v172_v59 = vadd.f32 1.0, %v170_v57 }
 0x10f   :  { %v175_v0 = vmul.f32 %v173_v60, %v123_v61 }
 0x110   :  { %v174_v62 = vmul.f32 %v172_v59, %v122_v58 }
 0x111   :  { %v180_v1 = vsel %vm176_vm3, %v175_v0, 0.0 }
 0x112   :  { %v177_v63 = vsel %vm176_vm3, %v174_v62, 0.0 }
 0x113   :  { %178 = vadd.xlane.f32.xlu0 %v177_v63 }
 0x117   :  { %181 = vadd.xlane.f32.xlu0 %v180_v1 }
 0x1a0   :  { %v179_v2 = vpop.xlane.xlu0 %178 }
 0x1a1   :  { %v184_v3 = vmul.f32 0.015625, %v179_v2 }
 0x1a3   :  { %v186_v4 = vsub.f32 %v174_v62, %v184_v3 }
 0x1a4   :  { %v182_v5 = vpop.xlane.xlu0 %181 }
 0x1a5   :  { %v185_v6 = vmul.f32 0.015625, %v182_v5  ;;  %v188_v7 = vmul.f32 %v186_v4, %v186_v4 }
 0x1a7   :  { %v187_v8 = vsub.f32 %v175_v0, %v185_v6  ;;  %v190_v9 = vsel %vm176_vm3, %v188_v7, 0.0 }
 0x1a8   :  { %191 = vadd.xlane.f32.xlu1 %v190_v9 }
 0x1a9   :  { %v189_v11 = vmul.f32 %v187_v8, %v187_v8 }
 0x1ab   :  { %v193_v10 = vsel %vm176_vm3, %v189_v11, 0.0 }
 0x1ac   :  { %194 = vadd.xlane.f32.xlu1 %v193_v10 }
 0x235   :  { %v192_v24 = vpop.xlane.xlu1 %191 }
 0x236   :  { %v196_v25 = vmul.f32 0.015625, %v192_v24 }
 0x238   :  { %v198_v26 = vadd.f32 1e-05, %v196_v25 }
 0x239   :  { %v195_v27 = vpop.xlane.xlu1 %194 }
 0x23a   :  { %426 = vrsqrt.f32 %v198_v26  ;;  %v197_v28 = vmul.f32 0.015625, %v195_v27 }
 0x23c   :  { %v199_v29 = vadd.f32 1e-05, %v197_v28 }
 0x23e   :  { %428 = vrsqrt.f32 %v199_v29 }
 0x244   :  { %v427_v30 = vpop.eup %426 }
 0x245   :  { %v202_v32 = vmul.f32 %v427_v30, %v186_v4 }
 0x247   :  { %v211_v34 = vmul.f32 %v339_v31, %v202_v32 }
 0x248   :  { %v429_v35 = vpop.eup %428 }
 0x249   :  { %v203_v36 = vmul.f32 %v429_v35, %v187_v8  ;;  %v220_v37 = vadd.f32 %v340_v33, %v211_v34 }
 0x24b   :  { %v212_v38 = vmul.f32 %v339_v31, %v203_v36  ;;  %387 = vmatprep.mubr.msk.f32.mxu1 %vm176_vm3, %v220_v37 }
 0x24d   :  { %v221_v39 = vadd.f32 %v340_v33, %v212_v38 }
 0x24f   :  { %388 = vmatmul.mubr.msk.f32.vlgmr.msra.gmra.mrb[0].mxu1 %vm176_vm3, %v221_v39 }
 0x322   :  { %v389_v41 = vpop.f32.mrb[0].mxu1 }
 0x323   :  { %v315_v42 = vadd.f32 %v389_v41, %v341_v40  ;;  %v309_v43 = vpop.f32.mrb[1].mxu1 }
 0x324   :  { %v310_v44 = vadd.f32 %v341_v40, %v309_v43 }
 0x325   :  { %319 = vst.msk [vmem:[#allocation2 + $0x8] sm:$0xff] %vm40_vm0, %v315_v42 }
 0x326   :  { %318 = vst.msk [vmem:[#allocation2] sm:$0xff] %vm40_vm0, %v310_v44 }
 0x327   :  { %441 = shalt.err (!%p438_p4)
}
 0x328   :  { %s442_s12 = scalar_lea.hbm %s581_s7, 256 }
 0x329   :  { %p443_p5 = scmp.ne.s32.totalorder %s581_s7, %s442_s12  ;;  %p446_p6 = scmp.lt.u32.totalorder %s442_s12, %s581_s7 }
 0x32b   :  { %p448_p7 = pnand %p446_p6, %p443_p5 }
 0x32d   :  { %451 = shalt.err (!%p448_p7)
}
 0x32e   :  { %s456_s14 = smov 128   ;;  %s457_s15 = smov 8  }
 0x32f   :  { %331 = dma.vmem_to_hbm [thread:$0]  %s326_s10, 256, %s581_s7, [#allocation3], %s456_s14, %s456_s14, %s457_s15  }
 0x330   :  { %452 = dma.done.wait [#allocation3], 256  }
 0x331   :  { %453 = vsyncadd [#allocation3], 4294967040 }
 0x332   :  { %335 = vsyncpa [#allocation3], 1 }

</bundles_post_ra>
